<compile_context>
chip_gen: v7x
topology: tpu7x:2x2x1
jax: 0.10.0
libtpu: 0.0.40
codegen_flags: <defaults>
</compile_context>

<pallas_src>
import functools

import numpy as np

import jax
import jax.numpy as jnp
from jax.experimental import pallas as pl
from jax.experimental.pallas import tpu as pltpu

LEAKY_SLOPE = 0.01   # nn.LeakyReLU() default negative_slope
BN_EPS = 1e-5        # nn.BatchNorm2d default eps


def _aspp_fused_kernel(x_ref, w_ref, gamma_ref, beta_ref, masks_ref, out_ref,
                       xpad_ref, col_ref,
                       *, N, Cin, Cout, H, W, KH, KW, dilation, padding, marg):
    """Fused dilated conv (single im2col matmul) + training-mode BatchNorm + LeakyReLU
    for the whole batch in one grid step.  Output is lane-dense flattened NCHW."""
    HW = H * W

    # ---- 1. Zero padding folded into the kernel: lane-margined flat copy of the input ----
    xpad_ref[...] = jnp.zeros(xpad_ref.shape, xpad_ref.dtype)
    for n in range(N):
        xpad_ref[n, :, marg:marg + HW] = x_ref[n]

    # ---- 2. im2col staging, directly in the (K, N*HW) lane-dense orientation.
    #         Each tap is a static lane slice (no reshape/relayout) times a 0/1 mask. ----
    for kh in range(KH):
        for kw in range(KW):
            dh = kh * dilation - padding           # tap offset in rows
            dw = kw * dilation - padding           # tap offset in cols
            shift = dh * W + dw                    # tap offset in flat lane space
            tap = kh * KW + kw
            mask = masks_ref[tap:tap + 1, :]       # (1, HW), compile-time constant data
            for n in range(N):
                src = xpad_ref[n, :, marg + shift:marg + shift + HW]   # (Cin, HW)
                col_ref[tap * Cin:(tap + 1) * Cin, n * HW:(n + 1) * HW] = src * mask

    # ---- 3. Single MXU contraction: (Cout, K) @ (K, N*HW) -> lane-dense NCHW result ----
    acc = jnp.dot(w_ref[...], col_ref[...], preferred_element_type=jnp.float32)  # (Cout, N*HW)

    # ---- 4. Training-mode BatchNorm (two-pass variance) + LeakyReLU, fused in-register ----
    inv_cnt = 1.0 / float(N * HW)
    mean = jnp.sum(acc, axis=1, keepdims=True) * inv_cnt                 # (Cout, 1)
    centered = acc - mean
    var = jnp.sum(centered * centered, axis=1, keepdims=True) * inv_cnt  # biased batch var
    scale = gamma_ref[...] * jax.lax.rsqrt(var + BN_EPS)                 # (Cout, 1), EUP rsqrt
    z = centered * scale + beta_ref[...]
    z = jnp.maximum(z, LEAKY_SLOPE * z)                                  # LeakyReLU, slope > 0

    # ---- 5. Lane-dense stores: one (Cout, HW) slab per batch element (flattened NCHW) ----
    for n in range(N):
        out_ref[n] = z[:, n * HW:(n + 1) * HW]


def _tap_masks(H, W, KH, KW, dilation, padding):
    """Per-tap 0/1 validity masks over the flattened (H*W) output positions.
    Computed with numpy at trace time -> constant-folded, no runtime cost."""
    masks = np.zeros((KH * KW, H * W), np.float32)
    for kh in range(KH):
        for kw in range(KW):
            dh = kh * dilation - padding
            dw = kw * dilation - padding
            m = np.zeros((H, W), np.float32)
            i0, i1 = max(0, -dh), min(H, H - dh)
            j0, j1 = max(0, -dw), min(W, W - dw)
            if i0 < i1 and j0 < j1:
                m[i0:i1, j0:j1] = 1.0
            masks[kh * KW + kw] = m.reshape(H * W)
    return jnp.asarray(masks)


@functools.partial(jax.jit, static_argnames=("padding", "dilation"))
def aspp_module_forward(x_nchw, weight_oihw, gamma, beta, *, padding, dilation):
    N, Cin, H, W = x_nchw.shape
    Cout, _, KH, KW = weight_oihw.shape
    Ho = H + 2 * padding - dilation * (KH - 1)
    Wo = W + 2 * padding - dilation * (KW - 1)
    if Ho != H or Wo != W:
        # _ASPPModule always uses 'same' geometry (1x1 p=0 d=1, or 3x3 p=d).
        raise NotImplementedError("kernel assumes 'same' conv geometry (padding == dilation*(k-1)/2)")

    HW = H * W
    K = KH * KW * Cin
    marg = padding * (W + 1)                 # max |tap lane shift|; 0 for 1x1 convs

    # Free reshape (bitcast) - no transpose / pad kernels in the wrapper.
    x_flat = x_nchw.reshape(N, Cin, HW).astype(jnp.float32)
    # OIHW -> (Cout, K), K ordered (kh, kw, ci) to match the im2col row order (tiny constant-ish op).
    w_mat = jnp.transpose(weight_oihw, (0, 2, 3, 1)).reshape(Cout, K).astype(jnp.float32)
    gamma2 = gamma.reshape(Cout, 1).astype(jnp.float32)
    beta2 = beta.reshape(Cout, 1).astype(jnp.float32)
    masks = _tap_masks(H, W, KH, KW, dilation, padding)          # (KH*KW, HW) constant

    kernel = functools.partial(
        _aspp_fused_kernel, N=N, Cin=Cin, Cout=Cout, H=H, W=W, KH=KH, KW=KW,
        dilation=dilation, padding=padding, marg=marg)

    out = pl.pallas_call(
        kernel,
        out_shape=jax.ShapeDtypeStruct((N, Cout, HW), jnp.float32),
        grid=(1,),
        in_specs=[pl.BlockSpec((N, Cin, HW), lambda i: (0, 0, 0)),
                  pl.BlockSpec((Cout, K), lambda i: (0, 0)),
                  pl.BlockSpec((Cout, 1), lambda i: (0, 0)),
                  pl.BlockSpec((Cout, 1), lambda i: (0, 0)),
                  pl.BlockSpec((KH * KW, HW), lambda i: (0, 0))],
        out_specs=pl.BlockSpec((N, Cout, HW), lambda i: (0, 0, 0)),
        scratch_shapes=[pltpu.VMEM((N, Cin, HW + 2 * marg), jnp.float32),   # padded flat input
                        pltpu.VMEM((K, N * HW), jnp.float32)],              # im2col matrix
        compiler_params=pltpu.CompilerParams(
            dimension_semantics=("arbitrary",)),
    )(x_flat, w_mat, gamma2, beta2, masks)

    # Already channel-major flattened NCHW: unflattening the spatial dim is free.
    return out.reshape(N, Cout, H, W)


def _reference(x, weight, gamma, beta, *, padding, dilation):
    """Pure-JAX reference of the PyTorch forward (train-mode BN, LeakyReLU 0.01)."""
    y = jax.lax.conv_general_dilated(
        x, weight, window_strides=(1, 1),
        padding=((padding, padding), (padding, padding)),
        rhs_dilation=(dilation, dilation),
        dimension_numbers=("NCHW", "OIHW", "NCHW"))
    mean = y.mean(axis=(0, 2, 3), keepdims=True)
    var = y.var(axis=(0, 2, 3), keepdims=True)        # biased, as BN forward uses
    z = (y - mean) / jnp.sqrt(var + BN_EPS) * gamma.reshape(1, -1, 1, 1) \
        + beta.reshape(1, -1, 1, 1)
    return jnp.where(z > 0, z, LEAKY_SLOPE * z)


if __name__ == "__main__":
    # _ASPPModule(inplanes=4, planes=8, kernel_size=3, padding=2, dilation=2)
    N, Cin, Cout, H, W = 2, 4, 8, 16, 16
    KH = KW = 3
    padding = dilation = 2

    key = jax.random.PRNGKey(0)
    kx, kw = jax.random.split(key)
    x = jax.random.normal(kx, (N, Cin, H, W), dtype=jnp.float32)
    weight = jax.random.normal(kw, (Cout, Cin, KH, KW), dtype=jnp.float32) * 0.1
    gamma = jnp.ones((Cout,), jnp.float32)   # BatchNorm2d default affine init
    beta = jnp.zeros((Cout,), jnp.float32)

    out = aspp_module_forward(x, weight, gamma, beta, padding=padding, dilation=dilation)
    out = jax.block_until_ready(out)

    ref = _reference(x, weight, gamma, beta, padding=padding, dilation=dilation)
    assert out.shape == (N, Cout, H, W), out.shape
    err = float(jnp.abs(out - ref).max())
    assert jnp.allclose(out, ref, atol=1e-4, rtol=1e-4), err

    print("KERNEL_OK")
</pallas_src>

<mosaic_0001>
module attributes {stable_mosaic.version = 11 : i64} {
  func.func @_aspp_fused_kernel(%arg0: i32, %arg1: memref<2x4x256xf32, #tpu.memory_space<vmem>>, %arg2: memref<8x36xf32, #tpu.memory_space<vmem>>, %arg3: memref<8x1xf32, #tpu.memory_space<vmem>>, %arg4: memref<8x1xf32, #tpu.memory_space<vmem>>, %arg5: memref<9x256xf32, #tpu.memory_space<vmem>>, %arg6: memref<2x8x256xf32, #tpu.memory_space<vmem>>, %arg7: memref<2x4x324xf32, #tpu.memory_space<vmem>>, %arg8: memref<36x512xf32, #tpu.memory_space<vmem>>) attributes {dimension_semantics = [#tpu.dimension_semantics<arbitrary>], iteration_bounds = array<i64: 1>, scalar_prefetch = 0 : i64, scratch_operands = 2 : i64, tpu.core_type = #tpu.core_type<tc>, window_params = [{pipeline_mode = #tpu.pipeline_mode<synchronous>, transform_indices = @transform_0, window_bounds = array<i64: 2, 4, 256>}, {pipeline_mode = #tpu.pipeline_mode<synchronous>, transform_indices = @transform_1, window_bounds = array<i64: 8, 36>}, {pipeline_mode = #tpu.pipeline_mode<synchronous>, transform_indices = @transform_2, window_bounds = array<i64: 8, 1>}, {pipeline_mode = #tpu.pipeline_mode<synchronous>, transform_indices = @transform_3, window_bounds = array<i64: 8, 1>}, {pipeline_mode = #tpu.pipeline_mode<synchronous>, transform_indices = @transform_4, window_bounds = array<i64: 9, 256>}, {pipeline_mode = #tpu.pipeline_mode<synchronous>, transform_indices = @transform_5, window_bounds = array<i64: 2, 8, 256>}]} {
    %cst = arith.constant 0.000000e+00 : f32
    %0 = vector.broadcast %cst : f32 to vector<2x4x324xf32>
    %c0 = arith.constant 0 : index
    %c0_0 = arith.constant 0 : index
    %c0_1 = arith.constant 0 : index
    %1 = vector.load %arg7[%c0, %c0_0, %c0_1] : memref<2x4x324xf32, #tpu.memory_space<vmem>>, vector<2x4x324xf32>
    tpu.vector_store %arg7[%c0, %c0_0, %c0_1], %0 {strides = array<i32>} : memref<2x4x324xf32, #tpu.memory_space<vmem>>, vector<2x4x324xf32>,
    %c0_2 = arith.constant 0 : index
    %c0_3 = arith.constant 0 : index
    %c0_4 = arith.constant 0 : index
    %2 = vector.load %arg1[%c0_2, %c0_3, %c0_4] : memref<2x4x256xf32, #tpu.memory_space<vmem>>, vector<1x4x256xf32>
    %3 = vector.shape_cast %2 : vector<1x4x256xf32> to vector<4x256xf32>
    %c0_5 = arith.constant 0 : index
    %c0_6 = arith.constant 0 : index
    %c34 = arith.constant 34 : index
    %4 = vector.load %arg7[%c0_5, %c0_6, %c34] : memref<2x4x324xf32, #tpu.memory_space<vmem>>, vector<1x4x256xf32>
    %5 = vector.shape_cast %4 : vector<1x4x256xf32> to vector<4x256xf32>
    %6 = vector.shape_cast %3 : vector<4x256xf32> to vector<1x4x256xf32>
    tpu.vector_store %arg7[%c0_5, %c0_6, %c34], %6 {strides = array<i32>} : memref<2x4x324xf32, #tpu.memory_space<vmem>>, vector<1x4x256xf32>,
    %c1 = arith.constant 1 : index
    %c0_7 = arith.constant 0 : index
    %c0_8 = arith.constant 0 : index
    %7 = vector.load %arg1[%c1, %c0_7, %c0_8] : memref<2x4x256xf32, #tpu.memory_space<vmem>>, vector<1x4x256xf32>
    %8 = vector.shape_cast %7 : vector<1x4x256xf32> to vector<4x256xf32>
    %c1_9 = arith.constant 1 : index
    %c0_10 = arith.constant 0 : index
    %c34_11 = arith.constant 34 : index
    %9 = vector.load %arg7[%c1_9, %c0_10, %c34_11] : memref<2x4x324xf32, #tpu.memory_space<vmem>>, vector<1x4x256xf32>
    %10 = vector.shape_cast %9 : vector<1x4x256xf32> to vector<4x256xf32>
    %11 = vector.shape_cast %8 : vector<4x256xf32> to vector<1x4x256xf32>
    tpu.vector_store %arg7[%c1_9, %c0_10, %c34_11], %11 {strides = array<i32>} : memref<2x4x324xf32, #tpu.memory_space<vmem>>, vector<1x4x256xf32>,
    %c0_12 = arith.constant 0 : index
    %c0_13 = arith.constant 0 : index
    %12 = vector.load %arg5[%c0_12, %c0_13] : memref<9x256xf32, #tpu.memory_space<vmem>>, vector<1x256xf32>
    %c0_14 = arith.constant 0 : index
    %c0_15 = arith.constant 0 : index
    %c0_16 = arith.constant 0 : index
    %13 = vector.load %arg7[%c0_14, %c0_15, %c0_16] : memref<2x4x324xf32, #tpu.memory_space<vmem>>, vector<1x4x256xf32>
    %14 = vector.shape_cast %13 : vector<1x4x256xf32> to vector<4x256xf32>
    %15 = vector.broadcast %12 : vector<1x256xf32> to vector<4x256xf32>
    %16 = arith.mulf %14, %15 : vector<4x256xf32>
    %c0_17 = arith.constant 0 : index
    %c0_18 = arith.constant 0 : index
    %17 = vector.load %arg8[%c0_17, %c0_18] : memref<36x512xf32, #tpu.memory_space<vmem>>, vector<4x256xf32>
    tpu.vector_store %arg8[%c0_17, %c0_18], %16 {strides = array<i32>} : memref<36x512xf32, #tpu.memory_space<vmem>>, vector<4x256xf32>,
    %c1_19 = arith.constant 1 : index
    %c0_20 = arith.constant 0 : index
    %c0_21 = arith.constant 0 : index
    %18 = vector.load %arg7[%c1_19, %c0_20, %c0_21] : memref<2x4x324xf32, #tpu.memory_space<vmem>>, vector<1x4x256xf32>
    %19 = vector.shape_cast %18 : vector<1x4x256xf32> to vector<4x256xf32>
    %20 = vector.broadcast %12 : vector<1x256xf32> to vector<4x256xf32>
    %21 = arith.mulf %19, %20 : vector<4x256xf32>
    %c0_22 = arith.constant 0 : index
    %c256 = arith.constant 256 : index
    %22 = vector.load %arg8[%c0_22, %c256] : memref<36x512xf32, #tpu.memory_space<vmem>>, vector<4x256xf32>
    tpu.vector_store %arg8[%c0_22, %c256], %21 {strides = array<i32>} : memref<36x512xf32, #tpu.memory_space<vmem>>, vector<4x256xf32>,
    %c1_23 = arith.constant 1 : index
    %c0_24 = arith.constant 0 : index
    %23 = vector.load %arg5[%c1_23, %c0_24] : memref<9x256xf32, #tpu.memory_space<vmem>>, vector<1x256xf32>
    %c0_25 = arith.constant 0 : index
    %c0_26 = arith.constant 0 : index
    %c2 = arith.constant 2 : index
    %24 = vector.load %arg7[%c0_25, %c0_26, %c2] : memref<2x4x324xf32, #tpu.memory_space<vmem>>, vector<1x4x256xf32>
    %25 = vector.shape_cast %24 : vector<1x4x256xf32> to vector<4x256xf32>
    %26 = vector.broadcast %23 : vector<1x256xf32> to vector<4x256xf32>
    %27 = arith.mulf %25, %26 : vector<4x256xf32>
    %c4 = arith.constant 4 : index
    %c0_27 = arith.constant 0 : index
    %28 = vector.load %arg8[%c4, %c0_27] : memref<36x512xf32, #tpu.memory_space<vmem>>, vector<4x256xf32>
    tpu.vector_store %arg8[%c4, %c0_27], %27 {strides = array<i32>} : memref<36x512xf32, #tpu.memory_space<vmem>>, vector<4x256xf32>,
    %c1_28 = arith.constant 1 : index
    %c0_29 = arith.constant 0 : index
    %c2_30 = arith.constant 2 : index
    %29 = vector.load %arg7[%c1_28, %c0_29, %c2_30] : memref<2x4x324xf32, #tpu.memory_space<vmem>>, vector<1x4x256xf32>
    %30 = vector.shape_cast %29 : vector<1x4x256xf32> to vector<4x256xf32>
    %31 = vector.broadcast %23 : vector<1x256xf32> to vector<4x256xf32>
    %32 = arith.mulf %30, %31 : vector<4x256xf32>
    %c4_31 = arith.constant 4 : index
    %c256_32 = arith.constant 256 : index
    %33 = vector.load %arg8[%c4_31, %c256_32] : memref<36x512xf32, #tpu.memory_space<vmem>>, vector<4x256xf32>
    tpu.vector_store %arg8[%c4_31, %c256_32], %32 {strides = array<i32>} : memref<36x512xf32, #tpu.memory_space<vmem>>, vector<4x256xf32>,
    %c2_33 = arith.constant 2 : index
    %c0_34 = arith.constant 0 : index
    %34 = vector.load %arg5[%c2_33, %c0_34] : memref<9x256xf32, #tpu.memory_space<vmem>>, vector<1x256xf32>
    %c0_35 = arith.constant 0 : index
    %c0_36 = arith.constant 0 : index
    %c4_37 = arith.constant 4 : index
    %35 = vector.load %arg7[%c0_35, %c0_36, %c4_37] : memref<2x4x324xf32, #tpu.memory_space<vmem>>, vector<1x4x256xf32>
    %36 = vector.shape_cast %35 : vector<1x4x256xf32> to vector<4x256xf32>
    %37 = vector.broadcast %34 : vector<1x256xf32> to vector<4x256xf32>
    %38 = arith.mulf %36, %37 : vector<4x256xf32>
    %c8 = arith.constant 8 : index
    %c0_38 = arith.constant 0 : index
    %39 = vector.load %arg8[%c8, %c0_38] : memref<36x512xf32, #tpu.memory_space<vmem>>, vector<4x256xf32>
    tpu.vector_store %arg8[%c8, %c0_38], %38 {strides = array<i32>} : memref<36x512xf32, #tpu.memory_space<vmem>>, vector<4x256xf32>,
    %c1_39 = arith.constant 1 : index
    %c0_40 = arith.constant 0 : index
    %c4_41 = arith.constant 4 : index
    %40 = vector.load %arg7[%c1_39, %c0_40, %c4_41] : memref<2x4x324xf32, #tpu.memory_space<vmem>>, vector<1x4x256xf32>
    %41 = vector.shape_cast %40 : vector<1x4x256xf32> to vector<4x256xf32>
    %42 = vector.broadcast %34 : vector<1x256xf32> to vector<4x256xf32>
    %43 = arith.mulf %41, %42 : vector<4x256xf32>
    %c8_42 = arith.constant 8 : index
    %c256_43 = arith.constant 256 : index
    %44 = vector.load %arg8[%c8_42, %c256_43] : memref<36x512xf32, #tpu.memory_space<vmem>>, vector<4x256xf32>
    tpu.vector_store %arg8[%c8_42, %c256_43], %43 {strides = array<i32>} : memref<36x512xf32, #tpu.memory_space<vmem>>, vector<4x256xf32>,
    %c3 = arith.constant 3 : index
    %c0_44 = arith.constant 0 : index
    %45 = vector.load %arg5[%c3, %c0_44] : memref<9x256xf32, #tpu.memory_space<vmem>>, vector<1x256xf32>
    %c0_45 = arith.constant 0 : index
    %c0_46 = arith.constant 0 : index
    %c32 = arith.constant 32 : index
    %46 = vector.load %arg7[%c0_45, %c0_46, %c32] : memref<2x4x324xf32, #tpu.memory_space<vmem>>, vector<1x4x256xf32>
    %47 = vector.shape_cast %46 : vector<1x4x256xf32> to vector<4x256xf32>
    %48 = vector.broadcast %45 : vector<1x256xf32> to vector<4x256xf32>
    %49 = arith.mulf %47, %48 : vector<4x256xf32>
    %c12 = arith.constant 12 : index
    %c0_47 = arith.constant 0 : index
    %50 = vector.load %arg8[%c12, %c0_47] : memref<36x512xf32, #tpu.memory_space<vmem>>, vector<4x256xf32>
    tpu.vector_store %arg8[%c12, %c0_47], %49 {strides = array<i32>} : memref<36x512xf32, #tpu.memory_space<vmem>>, vector<4x256xf32>,
    %c1_48 = arith.constant 1 : index
    %c0_49 = arith.constant 0 : index
    %c32_50 = arith.constant 32 : index
    %51 = vector.load %arg7[%c1_48, %c0_49, %c32_50] : memref<2x4x324xf32, #tpu.memory_space<vmem>>, vector<1x4x256xf32>
    %52 = vector.shape_cast %51 : vector<1x4x256xf32> to vector<4x256xf32>
    %53 = vector.broadcast %45 : vector<1x256xf32> to vector<4x256xf32>
    %54 = arith.mulf %52, %53 : vector<4x256xf32>
    %c12_51 = arith.constant 12 : index
    %c256_52 = arith.constant 256 : index
    %55 = vector.load %arg8[%c12_51, %c256_52] : memref<36x512xf32, #tpu.memory_space<vmem>>, vector<4x256xf32>
    tpu.vector_store %arg8[%c12_51, %c256_52], %54 {strides = array<i32>} : memref<36x512xf32, #tpu.memory_space<vmem>>, vector<4x256xf32>,
    %c4_53 = arith.constant 4 : index
    %c0_54 = arith.constant 0 : index
    %56 = vector.load %arg5[%c4_53, %c0_54] : memref<9x256xf32, #tpu.memory_space<vmem>>, vector<1x256xf32>
    %c0_55 = arith.constant 0 : index
    %c0_56 = arith.constant 0 : index
    %c34_57 = arith.constant 34 : index
    %57 = vector.load %arg7[%c0_55, %c0_56, %c34_57] : memref<2x4x324xf32, #tpu.memory_space<vmem>>, vector<1x4x256xf32>
    %58 = vector.shape_cast %57 : vector<1x4x256xf32> to vector<4x256xf32>
    %59 = vector.broadcast %56 : vector<1x256xf32> to vector<4x256xf32>
    %60 = arith.mulf %58, %59 : vector<4x256xf32>
    %c16 = arith.constant 16 : index
    %c0_58 = arith.constant 0 : index
    %61 = vector.load %arg8[%c16, %c0_58] : memref<36x512xf32, #tpu.memory_space<vmem>>, vector<4x256xf32>
    tpu.vector_store %arg8[%c16, %c0_58], %60 {strides = array<i32>} : memref<36x512xf32, #tpu.memory_space<vmem>>, vector<4x256xf32>,
    %c1_59 = arith.constant 1 : index
    %c0_60 = arith.constant 0 : index
    %c34_61 = arith.constant 34 : index
    %62 = vector.load %arg7[%c1_59, %c0_60, %c34_61] : memref<2x4x324xf32, #tpu.memory_space<vmem>>, vector<1x4x256xf32>
    %63 = vector.shape_cast %62 : vector<1x4x256xf32> to vector<4x256xf32>
    %64 = vector.broadcast %56 : vector<1x256xf32> to vector<4x256xf32>
    %65 = arith.mulf %63, %64 : vector<4x256xf32>
    %c16_62 = arith.constant 16 : index
    %c256_63 = arith.constant 256 : index
    %66 = vector.load %arg8[%c16_62, %c256_63] : memref<36x512xf32, #tpu.memory_space<vmem>>, vector<4x256xf32>
    tpu.vector_store %arg8[%c16_62, %c256_63], %65 {strides = array<i32>} : memref<36x512xf32, #tpu.memory_space<vmem>>, vector<4x256xf32>,
    %c5 = arith.constant 5 : index
    %c0_64 = arith.constant 0 : index
    %67 = vector.load %arg5[%c5, %c0_64] : memref<9x256xf32, #tpu.memory_space<vmem>>, vector<1x256xf32>
    %c0_65 = arith.constant 0 : index
    %c0_66 = arith.constant 0 : index
    %c36 = arith.constant 36 : index
    %68 = vector.load %arg7[%c0_65, %c0_66, %c36] : memref<2x4x324xf32, #tpu.memory_space<vmem>>, vector<1x4x256xf32>
    %69 = vector.shape_cast %68 : vector<1x4x256xf32> to vector<4x256xf32>
    %70 = vector.broadcast %67 : vector<1x256xf32> to vector<4x256xf32>
    %71 = arith.mulf %69, %70 : vector<4x256xf32>
    %c20 = arith.constant 20 : index
    %c0_67 = arith.constant 0 : index
    %72 = vector.load %arg8[%c20, %c0_67] : memref<36x512xf32, #tpu.memory_space<vmem>>, vector<4x256xf32>
    tpu.vector_store %arg8[%c20, %c0_67], %71 {strides = array<i32>} : memref<36x512xf32, #tpu.memory_space<vmem>>, vector<4x256xf32>,
    %c1_68 = arith.constant 1 : index
    %c0_69 = arith.constant 0 : index
    %c36_70 = arith.constant 36 : index
    %73 = vector.load %arg7[%c1_68, %c0_69, %c36_70] : memref<2x4x324xf32, #tpu.memory_space<vmem>>, vector<1x4x256xf32>
    %74 = vector.shape_cast %73 : vector<1x4x256xf32> to vector<4x256xf32>
    %75 = vector.broadcast %67 : vector<1x256xf32> to vector<4x256xf32>
    %76 = arith.mulf %74, %75 : vector<4x256xf32>
    %c20_71 = arith.constant 20 : index
    %c256_72 = arith.constant 256 : index
    %77 = vector.load %arg8[%c20_71, %c256_72] : memref<36x512xf32, #tpu.memory_space<vmem>>, vector<4x256xf32>
    tpu.vector_store %arg8[%c20_71, %c256_72], %76 {strides = array<i32>} : memref<36x512xf32, #tpu.memory_space<vmem>>, vector<4x256xf32>,
    %c6 = arith.constant 6 : index
    %c0_73 = arith.constant 0 : index
    %78 = vector.load %arg5[%c6, %c0_73] : memref<9x256xf32, #tpu.memory_space<vmem>>, vector<1x256xf32>
    %c0_74 = arith.constant 0 : index
    %c0_75 = arith.constant 0 : index
    %c64 = arith.constant 64 : index
    %79 = vector.load %arg7[%c0_74, %c0_75, %c64] : memref<2x4x324xf32, #tpu.memory_space<vmem>>, vector<1x4x256xf32>
    %80 = vector.shape_cast %79 : vector<1x4x256xf32> to vector<4x256xf32>
    %81 = vector.broadcast %78 : vector<1x256xf32> to vector<4x256xf32>
    %82 = arith.mulf %80, %81 : vector<4x256xf32>
    %c24 = arith.constant 24 : index
    %c0_76 = arith.constant 0 : index
    %83 = vector.load %arg8[%c24, %c0_76] : memref<36x512xf32, #tpu.memory_space<vmem>>, vector<4x256xf32>
    tpu.vector_store %arg8[%c24, %c0_76], %82 {strides = array<i32>} : memref<36x512xf32, #tpu.memory_space<vmem>>, vector<4x256xf32>,
    %c1_77 = arith.constant 1 : index
    %c0_78 = arith.constant 0 : index
    %c64_79 = arith.constant 64 : index
    %84 = vector.load %arg7[%c1_77, %c0_78, %c64_79] : memref<2x4x324xf32, #tpu.memory_space<vmem>>, vector<1x4x256xf32>
    %85 = vector.shape_cast %84 : vector<1x4x256xf32> to vector<4x256xf32>
    %86 = vector.broadcast %78 : vector<1x256xf32> to vector<4x256xf32>
    %87 = arith.mulf %85, %86 : vector<4x256xf32>
    %c24_80 = arith.constant 24 : index
    %c256_81 = arith.constant 256 : index
    %88 = vector.load %arg8[%c24_80, %c256_81] : memref<36x512xf32, #tpu.memory_space<vmem>>, vector<4x256xf32>
    tpu.vector_store %arg8[%c24_80, %c256_81], %87 {strides = array<i32>} : memref<36x512xf32, #tpu.memory_space<vmem>>, vector<4x256xf32>,
    %c7 = arith.constant 7 : index
    %c0_82 = arith.constant 0 : index
    %89 = vector.load %arg5[%c7, %c0_82] : memref<9x256xf32, #tpu.memory_space<vmem>>, vector<1x256xf32>
    %c0_83 = arith.constant 0 : index
    %c0_84 = arith.constant 0 : index
    %c66 = arith.constant 66 : index
    %90 = vector.load %arg7[%c0_83, %c0_84, %c66] : memref<2x4x324xf32, #tpu.memory_space<vmem>>, vector<1x4x256xf32>
    %91 = vector.shape_cast %90 : vector<1x4x256xf32> to vector<4x256xf32>
    %92 = vector.broadcast %89 : vector<1x256xf32> to vector<4x256xf32>
    %93 = arith.mulf %91, %92 : vector<4x256xf32>
    %c28 = arith.constant 28 : index
    %c0_85 = arith.constant 0 : index
    %94 = vector.load %arg8[%c28, %c0_85] : memref<36x512xf32, #tpu.memory_space<vmem>>, vector<4x256xf32>
    tpu.vector_store %arg8[%c28, %c0_85], %93 {strides = array<i32>} : memref<36x512xf32, #tpu.memory_space<vmem>>, vector<4x256xf32>,
    %c1_86 = arith.constant 1 : index
    %c0_87 = arith.constant 0 : index
    %c66_88 = arith.constant 66 : index
    %95 = vector.load %arg7[%c1_86, %c0_87, %c66_88] : memref<2x4x324xf32, #tpu.memory_space<vmem>>, vector<1x4x256xf32>
    %96 = vector.shape_cast %95 : vector<1x4x256xf32> to vector<4x256xf32>
    %97 = vector.broadcast %89 : vector<1x256xf32> to vector<4x256xf32>
    %98 = arith.mulf %96, %97 : vector<4x256xf32>
    %c28_89 = arith.constant 28 : index
    %c256_90 = arith.constant 256 : index
    %99 = vector.load %arg8[%c28_89, %c256_90] : memref<36x512xf32, #tpu.memory_space<vmem>>, vector<4x256xf32>
    tpu.vector_store %arg8[%c28_89, %c256_90], %98 {strides = array<i32>} : memref<36x512xf32, #tpu.memory_space<vmem>>, vector<4x256xf32>,
    %c8_91 = arith.constant 8 : index
    %c0_92 = arith.constant 0 : index
    %100 = vector.load %arg5[%c8_91, %c0_92] : memref<9x256xf32, #tpu.memory_space<vmem>>, vector<1x256xf32>
    %c0_93 = arith.constant 0 : index
    %c0_94 = arith.constant 0 : index
    %c68 = arith.constant 68 : index
    %101 = vector.load %arg7[%c0_93, %c0_94, %c68] : memref<2x4x324xf32, #tpu.memory_space<vmem>>, vector<1x4x256xf32>
    %102 = vector.shape_cast %101 : vector<1x4x256xf32> to vector<4x256xf32>
    %103 = vector.broadcast %100 : vector<1x256xf32> to vector<4x256xf32>
    %104 = arith.mulf %102, %103 : vector<4x256xf32>
    %c32_95 = arith.constant 32 : index
    %c0_96 = arith.constant 0 : index
    %105 = vector.load %arg8[%c32_95, %c0_96] : memref<36x512xf32, #tpu.memory_space<vmem>>, vector<4x256xf32>
    tpu.vector_store %arg8[%c32_95, %c0_96], %104 {strides = array<i32>} : memref<36x512xf32, #tpu.memory_space<vmem>>, vector<4x256xf32>,
    %c1_97 = arith.constant 1 : index
    %c0_98 = arith.constant 0 : index
    %c68_99 = arith.constant 68 : index
    %106 = vector.load %arg7[%c1_97, %c0_98, %c68_99] : memref<2x4x324xf32, #tpu.memory_space<vmem>>, vector<1x4x256xf32>
    %107 = vector.shape_cast %106 : vector<1x4x256xf32> to vector<4x256xf32>
    %108 = vector.broadcast %100 : vector<1x256xf32> to vector<4x256xf32>
    %109 = arith.mulf %107, %108 : vector<4x256xf32>
    %c32_100 = arith.constant 32 : index
    %c256_101 = arith.constant 256 : index
    %110 = vector.load %arg8[%c32_100, %c256_101] : memref<36x512xf32, #tpu.memory_space<vmem>>, vector<4x256xf32>
    tpu.vector_store %arg8[%c32_100, %c256_101], %109 {strides = array<i32>} : memref<36x512xf32, #tpu.memory_space<vmem>>, vector<4x256xf32>,
    %c0_102 = arith.constant 0 : index
    %c0_103 = arith.constant 0 : index
    %111 = vector.load %arg2[%c0_102, %c0_103] : memref<8x36xf32, #tpu.memory_space<vmem>>, vector<8x36xf32>
    %c0_104 = arith.constant 0 : index
    %c0_105 = arith.constant 0 : index
    %112 = vector.load %arg8[%c0_104, %c0_105] : memref<36x512xf32, #tpu.memory_space<vmem>>, vector<36x512xf32>
    %cst_106 = arith.constant dense<0.000000e+00> : vector<8x512xf32>
    %113 = tpu.matmul %111, %112, %cst_106 {dimension_numbers = #tpu.dot_dimension_numbers<[1], [0], [0], [1], [0, 0, 1, 1], [], []>} : vector<8x36xf32>, vector<36x512xf32>, vector<8x512xf32> -> vector<8x512xf32>
    %cst_107 = arith.constant dense<0.000000e+00> : vector<8xf32>
    %114 = vector.multi_reduction <add>, %113, %cst_107 [1] : vector<8x512xf32> to vector<8xf32>
    %115 = vector.shape_cast %114 : vector<8xf32> to vector<8x1xf32>
    %cst_108 = arith.constant 0.001953125 : f32
    %116 = vector.broadcast %cst_108 : f32 to vector<8x1xf32>
    %117 = arith.mulf %115, %116 : vector<8x1xf32>
    %118 = vector.broadcast %117 : vector<8x1xf32> to vector<8x512xf32>
    %119 = arith.subf %113, %118 : vector<8x512xf32>
    %120 = arith.mulf %119, %119 : vector<8x512xf32>
    %cst_109 = arith.constant dense<0.000000e+00> : vector<8xf32>
    %121 = vector.multi_reduction <add>, %120, %cst_109 [1] : vector<8x512xf32> to vector<8xf32>
    %122 = vector.shape_cast %121 : vector<8xf32> to vector<8x1xf32>
    %cst_110 = arith.constant 0.001953125 : f32
    %123 = vector.broadcast %cst_110 : f32 to vector<8x1xf32>
    %124 = arith.mulf %122, %123 : vector<8x1xf32>
    %c0_111 = arith.constant 0 : index
    %c0_112 = arith.constant 0 : index
    %125 = vector.load %arg3[%c0_111, %c0_112] : memref<8x1xf32, #tpu.memory_space<vmem>>, vector<8x1xf32>
    %cst_113 = arith.constant 9.99999974E-6 : f32
    %126 = vector.broadcast %cst_113 : f32 to vector<8x1xf32>
    %127 = arith.addf %124, %126 : vector<8x1xf32>
    %128 = math.rsqrt %127 : vector<8x1xf32>
    %129 = arith.mulf %125, %128 : vector<8x1xf32>
    %130 = vector.broadcast %129 : vector<8x1xf32> to vector<8x512xf32>
    %131 = arith.mulf %119, %130 : vector<8x512xf32>
    %c0_114 = arith.constant 0 : index
    %c0_115 = arith.constant 0 : index
    %132 = vector.load %arg4[%c0_114, %c0_115] : memref<8x1xf32, #tpu.memory_space<vmem>>, vector<8x1xf32>
    %133 = vector.broadcast %132 : vector<8x1xf32> to vector<8x512xf32>
    %134 = arith.addf %131, %133 : vector<8x512xf32>
    %cst_116 = arith.constant 0.00999999977 : f32
    %135 = vector.broadcast %cst_116 : f32 to vector<8x512xf32>
    %136 = arith.mulf %135, %134 : vector<8x512xf32>
    %137 = arith.maximumf %134, %136 : vector<8x512xf32>
    %138 = vector.extract_strided_slice %137 {offsets = [0, 0], sizes = [8, 256], strides = [1, 1]} : vector<8x512xf32> to vector<8x256xf32>
    %c0_117 = arith.constant 0 : index
    %c0_118 = arith.constant 0 : index
    %c0_119 = arith.constant 0 : index
    %139 = vector.load %arg6[%c0_117, %c0_118, %c0_119] : memref<2x8x256xf32, #tpu.memory_space<vmem>>, vector<1x8x256xf32>
    %140 = vector.shape_cast %139 : vector<1x8x256xf32> to vector<8x256xf32>
    %141 = vector.shape_cast %138 : vector<8x256xf32> to vector<1x8x256xf32>
    tpu.vector_store %arg6[%c0_117, %c0_118, %c0_119], %141 {strides = array<i32>} : memref<2x8x256xf32, #tpu.memory_space<vmem>>, vector<1x8x256xf32>,
    %142 = vector.extract_strided_slice %137 {offsets = [0, 256], sizes = [8, 256], strides = [1, 1]} : vector<8x512xf32> to vector<8x256xf32>
    %c1_120 = arith.constant 1 : index
    %c0_121 = arith.constant 0 : index
    %c0_122 = arith.constant 0 : index
    %143 = vector.load %arg6[%c1_120, %c0_121, %c0_122] : memref<2x8x256xf32, #tpu.memory_space<vmem>>, vector<1x8x256xf32>
    %144 = vector.shape_cast %143 : vector<1x8x256xf32> to vector<8x256xf32>
    %145 = vector.shape_cast %142 : vector<8x256xf32> to vector<1x8x256xf32>
    tpu.vector_store %arg6[%c1_120, %c0_121, %c0_122], %145 {strides = array<i32>} : memref<2x8x256xf32, #tpu.memory_space<vmem>>, vector<1x8x256xf32>,
    return
  }
  func.func @transform_0(%arg0: i32) -> (i32, i32, i32) {
    %c0_i32 = arith.constant 0 : i32
    %c0_i32_0 = arith.constant 0 : i32
    %c0_i32_1 = arith.constant 0 : i32
    %c0_i32_2 = arith.constant 0 : i32
    return %c0_i32, %c0_i32_0, %c0_i32_1 : i32, i32, i32
  }
  func.func @transform_1(%arg0: i32) -> (i32, i32) {
    %c0_i32 = arith.constant 0 : i32
    %c0_i32_0 = arith.constant 0 : i32
    %c0_i32_1 = arith.constant 0 : i32
    return %c0_i32, %c0_i32_0 : i32, i32
  }
  func.func @transform_2(%arg0: i32) -> (i32, i32) {
    %c0_i32 = arith.constant 0 : i32
    %c0_i32_0 = arith.constant 0 : i32
    %c0_i32_1 = arith.constant 0 : i32
    return %c0_i32, %c0_i32_0 : i32, i32
  }
  func.func @transform_3(%arg0: i32) -> (i32, i32) {
    %c0_i32 = arith.constant 0 : i32
    %c0_i32_0 = arith.constant 0 : i32
    %c0_i32_1 = arith.constant 0 : i32
    return %c0_i32, %c0_i32_0 : i32, i32
  }
  func.func @transform_4(%arg0: i32) -> (i32, i32) {
    %c0_i32 = arith.constant 0 : i32
    %c0_i32_0 = arith.constant 0 : i32
    %c0_i32_1 = arith.constant 0 : i32
    return %c0_i32, %c0_i32_0 : i32, i32
  }
  func.func @transform_5(%arg0: i32) -> (i32, i32, i32) {
    %c0_i32 = arith.constant 0 : i32
    %c0_i32_0 = arith.constant 0 : i32
    %c0_i32_1 = arith.constant 0 : i32
    %c0_i32_2 = arith.constant 0 : i32
    return %c0_i32, %c0_i32_0, %c0_i32_1 : i32, i32, i32
  }
}

</mosaic_0001>

<bundles_post_ra>
// kernel: aspp_module_forward.1
= control target key start
LH: loop header
LB: loop body
LE: loop exit
PB: predicated region body
PF: predicated region fallthrough
CT: control target
= control target key end

     0   :  { %v55_v0 = vlaneseq  ;;  %vm21_vm0 = vcmask 551936   ;;  %v841_v2 = vmov 0.0   ;;  %s842_s20 = smov 34   ;;  %s843_s9 = smov 4   ;;  %vm34_vm1 = vcmask 1043728   ;;  %s1175_s0 = inlined_call_operand.vmem [shape: f32[2,4,256], index: 0, kind: input, shape index: {}]   ;;  %s1176_s4 = inlined_call_operand.vmem [shape: f32[9,256], index: 4, kind: input, shape index: {}]   ;;  %s1177_s1 = inlined_call_operand.vmem [shape: f32[8,36], index: 1, kind: input, shape index: {}]   ;;  %s1178_s3 = inlined_call_operand.vmem [shape: f32[8,1], index: 3, kind: input, shape index: {}]   ;;  %s1179_s2 = inlined_call_operand.vmem [shape: f32[8,1], index: 2, kind: input, shape index: {}]   ;;  %s1180_s5 = inlined_call_operand.vmem [shape: f32[2,8,256], index: 5, kind: output, shape index: {}]  }
   0x1   :  { %v25_v1 = vld [vmem:[%s1175_s0] sm:$0xff]  ;;  %20 = vst [vmem:[#allocation2] sm:$0xff] %v841_v2  ;;  %22 = vst.msk [vmem:[#allocation2 + $0x8] sm:$0xf] %vm21_vm0, %v841_v2  ;;  %649 = vmatprep.mubr.f32.mxu0 %v841_v2  ;;  %720 = vmatprep.mubr.f32.mxu1 %v841_v2  ;;  %v787_v3 = vld [vmem:[%s1175_s0 + $0x8] sm:$0xff]  ;;  %s844_s10 = smov 32  }
   0x2   :  { %23 = vst [vmem:[#allocation2 + $0xc] sm:$0xff] %v841_v2  ;;  %24 = vst.msk [vmem:[#allocation2 + $0x14] sm:$0xf] %vm21_vm0, %v841_v2  ;;  %27 = vrot.lane.b32.xlu0 %v25_v1, %s842_s20  ;;  %v56_v4 = vshrl.u32 %v55_v0, 7  ;;  %s845_s15 = smov 2   ;;  %s846_s16 = smov 64  }
   0x3   :  { %v789_v5 = vld [vmem:[%s1176_s4 + $0x2] ss:$8 sm:$0x3]  ;;  %v790_v6 = vld [vmem:[%s1176_s4 + $0x3] ss:$8 sm:$0x3] }
   0x4   :  { %v788_v7 = vld [vmem:[%s1176_s4 + $0x1] ss:$8 sm:$0x3]  ;;  %v57_v8 = vsub.s32 0, %v56_v4  ;;  %v61_v9 = vsub.s32 1, %v56_v4  ;;  %s847_s19 = smov 66  }
   0x5   :  { %v793_v10 = vld [vmem:[%s1176_s4 + $0x6] ss:$8 sm:$0x3]  ;;  %v791_v15 = vld [vmem:[%s1176_s4 + $0x4] ss:$8 sm:$0x3] }
   0x6   :  { %43 = vrot.lane.b32.xlu0 %v787_v3, %s842_s20  ;;  %v146_v11 = vrot.slane %v789_v5, %v57_v8  ;;  %v150_v12 = vrot.slane %v789_v5, %v61_v9  ;;  %v204_v13 = vrot.slane %v790_v6, %v57_v8  ;;  %v208_v14 = vrot.slane %v790_v6, %v61_v9  ;;  %v794_v20 = vld [vmem:[%s1176_s4 + $0x7] ss:$8 sm:$0x3]  ;;  %v792_v29 = vld [vmem:[%s1176_s4 + $0x5] ss:$8 sm:$0x3] }
   0x7   :  { %v86_v16 = vrot.slane %v788_v7, %v57_v8  ;;  %v90_v17 = vrot.slane %v788_v7, %v61_v9  ;;  %v381_v18 = vrot.slane %v793_v10, %v57_v8  ;;  %v385_v19 = vrot.slane %v793_v10, %v61_v9  ;;  %v52_v30 = vld [vmem:[%s1176_s4] ss:$8 sm:$0x3]  ;;  %v795_v37 = vld [vmem:[%s1176_s4 + $0x10] ss:$8 sm:$0x3] }
   0x8   :  { %v151_v21 = vcombine.low %v146_v11, %v150_v12  ;;  %v209_v22 = vcombine.low %v204_v13, %v208_v14  ;;  %v264_v24 = vrot.slane %v791_v15, %v57_v8  ;;  %v268_v25 = vrot.slane %v791_v15, %v61_v9  ;;  %s848_s21 = smov 36   ;;  %s849_s22 = smov 68  }
   0x9   :  { %v91_v23 = vcombine.low %v86_v16, %v90_v17  ;;  %v386_v26 = vcombine.low %v381_v18, %v385_v19  ;;  %v438_v27 = vrot.slane %v794_v20, %v57_v8  ;;  %v442_v28 = vrot.slane %v794_v20, %v61_v9  ;;  %s850_s4 = smov 124   ;;  %s852_s23 = smov 126  }
   0xa   :  { %152 = vrot.lane.b32.xlu1 %v151_v21, %s843_s9  ;;  %210 = vrot.lane.b32.xlu0 %v209_v22, %s844_s10  ;;  %v269_v31 = vcombine.low %v264_v24, %v268_v25  ;;  %v321_v32 = vrot.slane %v792_v29, %v57_v8  ;;  %v325_v33 = vrot.slane %v792_v29, %v61_v9  ;;  %vm35_vm2 = vcmask 1047556   ;;  %s853_s24 = smov 96   ;;  %s854_s25 = smov 92  }
   0xb   :  { %v443_v34 = vcombine.low %v438_v27, %v442_v28  ;;  %v58_v35 = vrot.slane %v52_v30, %v57_v8  ;;  %v62_v36 = vrot.slane %v52_v30, %v61_v9  ;;  %v498_v40 = vrot.slane %v795_v37, %v57_v8  ;;  %vm36_vm5 = vmor %vm35_vm2, %vm34_vm1  ;;  %s855_s26 = smov 60   ;;  %s856_s27 = smov 62  }
   0xc   :  { %v326_v39 = vcombine.low %v321_v32, %v325_v33  ;;  %v502_v41 = vrot.slane %v795_v37, %v61_v9  ;;  %vm30_vm3 = vcmask 277504   ;;  %vm38_vm4 = vcmask 273408  }
   0xd   :  { %v924_v38 = vcombine.low %v58_v35, %v62_v36  ;;  %vm95_vm6 = vcmask 15360   ;;  %vm213_vm7 = vcmask 261120   ;;  %vm155_vm8 = vcmask 31744  }
   0xe   :  { %92 = vrot.lane.b32.xlu1 %v91_v23, %s845_s15  ;;  %387 = vrot.lane.b32.xlu0 %v386_v26, %s846_s16  ;;  %v503_v42 = vcombine.low %v498_v40, %v502_v41  ;;  %vm330_vm9 = vcmask 293888   ;;  %vm447_vm10 = vcmask 539648   ;;  %vm390_vm11 = vcmask 523264  }
   0xf   :  { %vm507_vm12 = vcmask 556032   ;;  %vm111_vm13 = vcmask 1031168   ;;  %vm229_vm14 = vcmask 785408   ;;  %vm346_vm15 = vcmask 752640  }
  0x10   :  { %vm463_vm0 = vcmask 506880   ;;  %vm170_vm1 = vcmask 1014784   ;;  %vm287_vm2 = vcmask 769024  }
  0x12   :  { %270 = vrot.lane.b32.xlu1 %v269_v31, %s842_s20  ;;  %444 = vrot.lane.b32.xlu0 %v443_v34, %s847_s19  ;;  %s851_s20 = smov 94  }
  0x16   :  { %327 = vrot.lane.b32.xlu1 %v326_v39, %s848_s21 }
  0x1a   :  { %504 = vrot.lane.b32.xlu1 %v503_v42, %s849_s22 }
  0x74   :  { %v28_v43 = vpop.permute.xlu0 %27 }
  0x75   :  { %v29_v44 = vrot.slane %v28_v43, 4 }
  0x77   :  { %v31_v45 = vsel %vm30_vm3, %v29_v44, %v28_v43  ;;  %39 = vst.msk [vmem:[#allocation2 + $0x8] sm:$0xf] %vm38_vm4, %v29_v44 }
  0x78   :  { %37 = vst.msk [vmem:[#allocation2] sm:$0xff] %vm36_vm5, %v31_v45  ;;  %v44_v46 = vpop.permute.xlu0 %43 }
  0x79   :  { %v45_v47 = vrot.slane %v44_v46, 4 }
  0x7b   :  { %v46_v48 = vsel %vm30_vm3, %v45_v47, %v44_v46  ;;  %51 = vst.msk [vmem:[#allocation2 + $0x14] sm:$0xf] %vm38_vm4, %v45_v47  ;;  %vm572_vm4 = vcmask 1043456  }
  0x7c   :  { %50 = vst.msk [vmem:[#allocation2 + $0xc] sm:$0xff] %vm36_vm5, %v46_v48  ;;  %v153_v49 = vpop.permute.xlu1 %152  ;;  %v211_v51 = vpop.permute.xlu0 %210 }
  0x7d   :  { %v154_v50 = vrot.slane %v153_v49, 4  ;;  %v936_v61 = vrot.slane %v211_v51, 4 }
  0x7e   :  { %v141_v52 = vld [vmem:[#allocation2 + $0x8] sm:$0xf] }
  0x7f   :  { %v929_v53 = vld [vmem:[#allocation2] sm:$0xff]  ;;  %v160_v54 = vmul.f32 %v154_v50, %v141_v52  ;;  %v259_v2 = vld [vmem:[#allocation2 + $0x8] sm:$0xf]  ;;  %v214_v6 = vsel %vm213_vm7, %v936_v61, %v211_v51  ;;  %v156_v14 = vsel %vm155_vm8, %v154_v50, %v153_v49 }
  0x80   :  { %v93_v55 = vpop.permute.xlu1 %92  ;;  %v65_v56 = vmul.f32 %v924_v38, %v929_v53  ;;  %v388_v63 = vpop.permute.xlu0 %387  ;;  %v376_v8 = vld [vmem:[#allocation2 + $0x8] sm:$0xf]  ;;  %v951_v9 = vmul.f32 %v214_v6, %v929_v53  ;;  %v159_v32 = vmul.f32 %v156_v14, %v929_v53 }
  0x81   :  { %v933_v57 = vrot.slane %v93_v55, 4  ;;  %168 = vrot.lane.b32.xlu1 %v160_v54, %s850_s4  ;;  %v389_v4 = vrot.slane %v388_v63, 4  ;;  %v493_v28 = vld [vmem:[#allocation2 + $0x8] sm:$0xf] }
  0x82   :  { %v178_v58 = vld [vmem:[#allocation2 + $0x14] sm:$0xf]  ;;  %v67_v59 = vcombine.high %v65_v56, %v65_v56  ;;  %69 = vst [vmem:[#allocation3] sm:$0xf] %v65_v56  ;;  %v81_v37 = vld [vmem:[#allocation2 + $0x8] sm:$0xf] }
  0x83   :  { %v180_v60 = vmul.f32 %v178_v58, %v154_v50  ;;  %v939_v62 = vsel %vm95_vm6, %v933_v57, %v93_v55  ;;  %v395_v10 = vmul.f32 %v389_v4, %v376_v8  ;;  %v953_v11 = vld [vmem:[#allocation2 + $0xc] sm:$0xff]  ;;  %v295_v15 = vld [vmem:[#allocation2 + $0x14] sm:$0xf]  ;;  %v391_v34 = vsel %vm390_vm11, %v389_v4, %v388_v63  ;;  %v199_v41 = vld [vmem:[#allocation2 + $0x8] sm:$0xf] }
  0x84   :  { %v271_v0 = vpop.permute.xlu1 %270  ;;  %70 = vst [vmem:[#allocation3 + $0x8] sm:$0xf] %v67_v59  ;;  %v944_v3 = vmul.f32 %v939_v62, %v929_v53  ;;  %v445_v13 = vpop.permute.xlu0 %444  ;;  %v961_v16 = vmul.f32 %v156_v14, %v953_v11  ;;  %v412_v21 = vld [vmem:[#allocation2 + $0x14] sm:$0xf]  ;;  %v72_v22 = vmul.f32 %v953_v11, %v924_v38  ;;  %v120_v35 = vmul.f32 %v939_v62, %v953_v11  ;;  %v316_v45 = vld [vmem:[#allocation2 + $0x8] sm:$0xf] }
  0x85   :  { %v272_v1 = vrot.slane %v271_v0, 4  ;;  %188 = vrot.lane.b32.xlu0 %v180_v60, %s850_s4  ;;  %v963_v18 = vrot.slane %v445_v13, 4  ;;  %v414_v25 = vmul.f32 %v412_v21, %v389_v4  ;;  %v1000_v36 = vmul.f32 %v391_v34, %v929_v53  ;;  %v433_v49 = vld [vmem:[#allocation2 + $0x8] sm:$0xf]  ;;  %v119_v55 = vld [vmem:[#allocation2 + $0x14] sm:$0xf] }
  0x86   :  { %v74_v26 = vcombine.high %v72_v22, %v72_v22  ;;  %76 = vst [vmem:[#allocation3 + $0x10] sm:$0xf] %v72_v22  ;;  %v238_v38 = vmul.f32 %v214_v6, %v953_v11  ;;  %v100_v40 = vmul.f32 %v933_v57, %v81_v37  ;;  %v218_v44 = vmul.f32 %v936_v61, %v199_v41  ;;  %v354_v56 = vld [vmem:[#allocation2 + $0x14] sm:$0xf] }
  0x87   :  { %v277_v5 = vmul.f32 %v272_v1, %v259_v2  ;;  %v297_v17 = vmul.f32 %v295_v15, %v272_v1  ;;  %v448_v27 = vsel %vm447_vm10, %v963_v18, %v445_v13  ;;  %v273_v31 = vsel %vm30_vm3, %v272_v1, %v271_v0  ;;  %v237_v63 = vld [vmem:[#allocation2 + $0x14] sm:$0xf] }
  0x88   :  { %v328_v7 = vpop.permute.xlu1 %327  ;;  %77 = vst [vmem:[#allocation3 + $0x18] sm:$0xf] %v74_v26  ;;  %v982_v29 = vmul.f32 %v448_v27, %v929_v53  ;;  %v991_v33 = vmul.f32 %v273_v31, %v929_v53  ;;  %v1014_v42 = vmul.f32 %v448_v27, %v953_v11  ;;  %v104_v43 = vcombine.low %v100_v40, %v100_v40  ;;  %v471_v0 = vld [vmem:[#allocation2 + $0x14] sm:$0xf] }
  0x89   :  { %285 = vrot.lane.b32.xlu1 %v277_v5, %s851_s20  ;;  %107 = vrot.lane.b32.xlu0 %v944_v3, %s852_s23  ;;  %v955_v12 = vrot.slane %v328_v7, 4  ;;  %v296_v46 = vmul.f32 %v273_v31, %v953_v11  ;;  %v222_v47 = vcombine.low %v218_v44, %v218_v44  ;;  %v413_v50 = vmul.f32 %v391_v34, %v953_v11  ;;  %v530_v22 = vld [vmem:[#allocation2 + $0x14] sm:$0xf] }
  0x8a   :  { %v452_v52 = vmul.f32 %v963_v18, %v433_v49  ;;  %v121_v62 = vmul.f32 %v119_v55, %v933_v57  ;;  %v473_v4 = vmul.f32 %v471_v0, %v963_v18  ;;  %v239_v5 = vmul.f32 %v237_v63, %v936_v61 }
  0x8b   :  { %v331_v19 = vsel %vm330_vm9, %v955_v12, %v328_v7  ;;  %v335_v48 = vmul.f32 %v955_v12, %v316_v45  ;;  %v356_v60 = vmul.f32 %v354_v56, %v955_v12  ;;  %v183_v57 = vcombine.high %v961_v16, %v961_v16 }
  0x8c   :  { %v505_v20 = vpop.permute.xlu1 %504  ;;  %v973_v23 = vmul.f32 %v331_v19, %v929_v53  ;;  %v1007_v39 = vmul.f32 %v331_v19, %v953_v11  ;;  %v456_v59 = vcombine.low %v452_v52, %v452_v52  ;;  %v125_v2 = vcombine.low %v121_v62, %v121_v62 }
  0x8d   :  { %225 = vrot.lane.b32.xlu0 %v951_v9, %s853_s24  ;;  %403 = vrot.lane.b32.xlu1 %v395_v10, %s846_s16  ;;  %v975_v24 = vrot.slane %v505_v20, 4  ;;  %v339_v51 = vcombine.low %v335_v48, %v335_v48  ;;  %v360_v1 = vcombine.low %v356_v60, %v356_v60  ;;  %v243_v6 = vcombine.low %v239_v5, %v239_v5 }
  0x8e   :  { %v163_v7 = vcombine.high %v159_v32, %v159_v32  ;;  %v124_v8 = vcombine.low %v120_v35, %v120_v35  ;;  %v103_v61 = vcombine.low %v944_v3, %v944_v3  ;;  %v242_v10 = vcombine.low %v238_v38, %v238_v38 }
  0x8f   :  { %v512_v30 = vmul.f32 %v975_v24, %v493_v28  ;;  %v508_v54 = vsel %vm507_vm12, %v975_v24, %v505_v20  ;;  %v221_v12 = vcombine.low %v951_v9, %v951_v9  ;;  %v338_v13 = vcombine.low %v973_v23, %v973_v23 }
  0x90   :  { %v511_v58 = vmul.f32 %v508_v54, %v929_v53  ;;  %v477_v53 = vcombine.low %v473_v4, %v473_v4  ;;  %v280_v14 = vcombine.high %v991_v33, %v991_v33  ;;  %v398_v3 = vcombine.high %v1000_v36, %v1000_v36 }
  0x91   :  { %184 = vrot.lane.b32.xlu0 %v961_v16, %s850_s4  ;;  %305 = vrot.lane.b32.xlu1 %v297_v17, %s851_s20  ;;  %v455_v9 = vcombine.low %v982_v29, %v982_v29  ;;  %v300_v15 = vcombine.high %v296_v46, %v296_v46  ;;  %v359_v16 = vcombine.low %v1007_v39, %v1007_v39  ;;  %vm522_vm3 = vcmask 490496  }
  0x92   :  { %v531_v17 = vmul.f32 %v508_v54, %v953_v11  ;;  %v417_v18 = vcombine.high %v413_v50, %v413_v50  ;;  %v476_v19 = vcombine.low %v1014_v42, %v1014_v42  ;;  %v515_v20 = vcombine.high %v511_v58, %v511_v58 }
  0x94   :  { %v535_v21 = vcombine.high %v531_v17, %v531_v17 }
  0x95   :  { %342 = vrot.lane.b32.xlu0 %v973_v23, %s854_s25  ;;  %422 = vrot.lane.b32.xlu1 %v414_v25, %s846_s16  ;;  %v532_v23 = vmul.f32 %v530_v22, %v975_v24 }
  0x99   :  { %520 = vrot.lane.b32.xlu1 %v512_v30, %s855_s26  ;;  %459 = vrot.lane.b32.xlu0 %v982_v29, %s856_s27 }
  0x9d   :  { %164 = vrot.lane.b32.xlu1 %v159_v32, %s850_s4  ;;  %281 = vrot.lane.b32.xlu0 %v991_v33, %s851_s20 }
  0xa1   :  { %128 = vrot.lane.b32.xlu1 %v120_v35, %s852_s23  ;;  %399 = vrot.lane.b32.xlu0 %v1000_v36, %s846_s16 }
  0xa5   :  { %246 = vrot.lane.b32.xlu1 %v238_v38, %s853_s24  ;;  %363 = vrot.lane.b32.xlu0 %v1007_v39, %s854_s25 }
  0xa9   :  { %109 = vrot.lane.b32.xlu1 %v104_v43, %s852_s23  ;;  %480 = vrot.lane.b32.xlu0 %v1014_v42, %s856_s27 }
  0xad   :  { %227 = vrot.lane.b32.xlu1 %v222_v47, %s853_s24  ;;  %301 = vrot.lane.b32.xlu0 %v296_v46, %s851_s20 }
  0xb1   :  { %344 = vrot.lane.b32.xlu1 %v339_v51, %s854_s25  ;;  %418 = vrot.lane.b32.xlu0 %v413_v50, %s846_s16 }
  0xb5   :  { %461 = vrot.lane.b32.xlu1 %v456_v59, %s856_s27  ;;  %516 = vrot.lane.b32.xlu0 %v511_v58, %s855_s26 }
  0xb9   :  { %365 = vrot.lane.b32.xlu1 %v360_v1, %s854_s25  ;;  %130 = vrot.lane.b32.xlu0 %v125_v2, %s852_s23 }
  0xbd   :  { %482 = vrot.lane.b32.xlu1 %v477_v53, %s856_s27  ;;  %248 = vrot.lane.b32.xlu0 %v243_v6, %s853_s24 }
  0xc1   :  { %186 = vrot.lane.b32.xlu1 %v183_v57, %s850_s4  ;;  %166 = vrot.lane.b32.xlu0 %v163_v7, %s850_s4 }
  0xc5   :  { %126 = vrot.lane.b32.xlu1 %v124_v8, %s852_s23  ;;  %105 = vrot.lane.b32.xlu0 %v103_v61, %s852_s23 }
  0xc9   :  { %244 = vrot.lane.b32.xlu1 %v242_v10, %s853_s24  ;;  %223 = vrot.lane.b32.xlu0 %v221_v12, %s853_s24 }
  0xcd   :  { %340 = vrot.lane.b32.xlu1 %v338_v13, %s854_s25  ;;  %283 = vrot.lane.b32.xlu0 %v280_v14, %s851_s20 }
  0xd1   :  { %401 = vrot.lane.b32.xlu0 %v398_v3, %s846_s16  ;;  %457 = vrot.lane.b32.xlu1 %v455_v9, %s856_s27 }
  0xd5   :  { %303 = vrot.lane.b32.xlu0 %v300_v15, %s851_s20  ;;  %361 = vrot.lane.b32.xlu1 %v359_v16, %s854_s25 }
  0xd9   :  { %420 = vrot.lane.b32.xlu0 %v417_v18, %s846_s16  ;;  %478 = vrot.lane.b32.xlu1 %v476_v19, %s856_s27 }
  0xdd   :  { %518 = vrot.lane.b32.xlu0 %v515_v20, %s855_s26  ;;  %538 = vrot.lane.b32.xlu1 %v535_v21, %s855_s26 }
  0xe1   :  { %540 = vrot.lane.b32.xlu0 %v532_v23, %s855_s26  ;;  %536 = vrot.lane.b32.xlu1 %v531_v17, %s855_s26 }
  0xf3   :  { %v169_v11 = vpop.permute.xlu1 %168 }
  0xf7   :  { %v189_v25 = vpop.permute.xlu0 %188 }
  0xfb   :  { %v1078_v26 = vpop.permute.xlu1 %285  ;;  %v108_v27 = vpop.permute.xlu0 %107 }
  0xff   :  { %v1080_v28 = vpop.permute.xlu1 %403  ;;  %v1082_v29 = vpop.permute.xlu0 %225 }
 0x103   :  { %v1084_v30 = vpop.permute.xlu1 %305  ;;  %v185_v31 = vpop.permute.xlu0 %184 }
 0x107   :  { %v1086_v32 = vpop.permute.xlu1 %422  ;;  %v1088_v33 = vpop.permute.xlu0 %342 }
 0x10b   :  { %v1090_v24 = vpop.permute.xlu1 %520  ;;  %v1092_v34 = vpop.permute.xlu0 %459 }
 0x10f   :  { %v165_v35 = vpop.permute.xlu1 %164  ;;  %v1094_v36 = vpop.permute.xlu0 %281 }
 0x113   :  { %v129_v37 = vpop.permute.xlu1 %128  ;;  %v1096_v38 = vpop.permute.xlu0 %399 }
 0x117   :  { %v247_v39 = vpop.permute.xlu1 %246  ;;  %v1098_v40 = vpop.permute.xlu0 %363 }
 0x11b   :  { %v110_v41 = vpop.permute.xlu1 %109  ;;  %v1100_v42 = vpop.permute.xlu0 %480 }
 0x11c   :  { %v113_v43 = vsel %vm111_vm13, %v108_v27, %v110_v41 }
 0x11d   :  { %117 = vst [vmem:[#allocation3 + $0x8] sm:$0xf0] %v113_v43 }
 0x11f   :  { %v228_v44 = vpop.permute.xlu1 %227  ;;  %v1103_v45 = vpop.permute.xlu0 %301 }
 0x120   :  { %v231_v46 = vsel %vm229_vm14, %v1082_v29, %v228_v44 }
 0x121   :  { %235 = vst [vmem:[#allocation3 + $0x28] sm:$0xf0] %v231_v46 }
 0x123   :  { %v345_v47 = vpop.permute.xlu1 %344  ;;  %v1107_v48 = vpop.permute.xlu0 %418 }
 0x124   :  { %v348_v49 = vsel %vm346_vm15, %v1088_v33, %v345_v47  ;;  %v550_v12 = vld [vmem:[#allocation3 + $0x8] sm:$0xff] }
 0x125   :  { %352 = vst [vmem:[#allocation3 + $0x48] sm:$0xf0] %v348_v49 }
 0x127   :  { %v462_v50 = vpop.permute.xlu1 %461  ;;  %v1111_v51 = vpop.permute.xlu0 %516 }
 0x128   :  { %v465_v52 = vsel %vm463_vm0, %v1092_v34, %v462_v50 }
 0x129   :  { %469 = vst [vmem:[#allocation3 + $0x68] sm:$0xf0] %v465_v52 }
 0x12b   :  { %v366_v54 = vpop.permute.xlu1 %365  ;;  %v131_v55 = vpop.permute.xlu0 %130 }
 0x12c   :  { %v368_v56 = vsel %vm346_vm15, %v1098_v40, %v366_v54  ;;  %v133_v58 = vsel %vm111_vm13, %v129_v37, %v131_v55 }
 0x12d   :  { %372 = vst [vmem:[#allocation3 + $0x58] sm:$0xf0] %v368_v56  ;;  %137 = vst [vmem:[#allocation3 + $0x18] sm:$0xf0] %v133_v58 }
 0x12f   :  { %v483_v59 = vpop.permute.xlu1 %482  ;;  %v249_v60 = vpop.permute.xlu0 %248 }
 0x130   :  { %v485_v62 = vsel %vm463_vm0, %v1100_v42, %v483_v59  ;;  %v251_v63 = vsel %vm229_vm14, %v247_v39, %v249_v60 }
 0x131   :  { %489 = vst [vmem:[#allocation3 + $0x78] sm:$0xf0] %v485_v62  ;;  %255 = vst [vmem:[#allocation3 + $0x38] sm:$0xf0] %v251_v63 }
 0x133   :  { %v187_v0 = vpop.permute.xlu1 %186  ;;  %v167_v1 = vpop.permute.xlu0 %166 }
 0x134   :  { %v190_v2 = vsel %vm170_vm1, %v185_v31, %v187_v0  ;;  %v191_v4 = vsel %vm170_vm1, %v187_v0, %v189_v25  ;;  %v171_v5 = vsel %vm170_vm1, %v165_v35, %v167_v1  ;;  %v172_v53 = vsel %vm170_vm1, %v167_v1, %v169_v11  ;;  %v552_v9 = vld [vmem:[#allocation3 + $0x18] sm:$0xff] }
 0x135   :  { %194 = vst [vmem:[#allocation3 + $0x30] sm:$0xf] %v190_v2  ;;  %195 = vst [vmem:[#allocation3 + $0x38] sm:$0xf] %v191_v4 }
 0x136   :  { %175 = vst [vmem:[#allocation3 + $0x20] sm:$0xf] %v171_v5  ;;  %176 = vst [vmem:[#allocation3 + $0x28] sm:$0xf] %v172_v53  ;;  %v548_v5 = vld [vmem:[%s1177_s1] sm:$0xff] }
 0x137   :  { %v127_v6 = vpop.permute.xlu1 %126  ;;  %v106_v57 = vpop.permute.xlu0 %105 }
 0x138   :  { %v132_v7 = vsel %vm111_vm13, %v127_v6, %v129_v37  ;;  %v112_v8 = vsel %vm111_vm13, %v106_v57, %v108_v27 }
 0x139   :  { %136 = vst [vmem:[#allocation3 + $0x10] sm:$0xf0] %v132_v7  ;;  %116 = vst [vmem:[#allocation3] sm:$0xf0] %v112_v8 }
 0x13b   :  { %v245_v61 = vpop.permute.xlu1 %244  ;;  %v224_v10 = vpop.permute.xlu0 %223 }
 0x13c   :  { %v250_v13 = vsel %vm229_vm14, %v245_v61, %v247_v39  ;;  %v230_v14 = vsel %vm229_vm14, %v224_v10, %v1082_v29  ;;  %v556_v15 = vld [vmem:[#allocation3 + $0x38] sm:$0xff] }
 0x13d   :  { %v554_v3 = vld [vmem:[#allocation3 + $0x28] sm:$0xff]  ;;  %254 = vst [vmem:[#allocation3 + $0x30] sm:$0xf0] %v250_v13  ;;  %234 = vst [vmem:[#allocation3 + $0x20] sm:$0xf0] %v230_v14  ;;  %v812_v17 = vpack.c.bf16 %v556_v15, %v552_v9 }
 0x13e   :  { %v804_v16 = vpack.c.bf16 %v554_v3, %v550_v12 }
 0x13f   :  { %v341_v18 = vpop.permute.xlu1 %340  ;;  %813 = vmatprep.subr.bf16.mxu1 %v812_v17  ;;  %v284_v19 = vpop.permute.xlu0 %283 }
 0x140   :  { %805 = vmatprep.subr.bf16.mxu0 %v804_v16  ;;  %v347_v20 = vsel %vm346_vm15, %v341_v18, %v1088_v33  ;;  %v288_v21 = vsel %vm287_vm2, %v1094_v36, %v284_v19  ;;  %v289_v22 = vsel %vm287_vm2, %v284_v19, %v1078_v26  ;;  %v549_v25 = vld [vmem:[#allocation3] sm:$0xff]  ;;  %v551_v35 = vld [vmem:[#allocation3 + $0x10] sm:$0xff] }
 0x141   :  { %351 = vst [vmem:[#allocation3 + $0x40] sm:$0xf0] %v347_v20  ;;  %292 = vst [vmem:[#allocation3 + $0x40] sm:$0xf] %v288_v21 }
 0x142   :  { %293 = vst [vmem:[#allocation3 + $0x48] sm:$0xf] %v289_v22 }
 0x143   :  { %v458_v23 = vpop.permute.xlu1 %457  ;;  %v402_v11 = vpop.permute.xlu0 %401 }
 0x144   :  { %v464_v27 = vsel %vm463_vm0, %v458_v23, %v1092_v34  ;;  %v405_v29 = vsel %vm390_vm11, %v1096_v38, %v402_v11  ;;  %v406_v31 = vsel %vm390_vm11, %v402_v11, %v1080_v28  ;;  %v553_v33 = vld [vmem:[#allocation3 + $0x20] sm:$0xff]  ;;  %v555_v36 = vld [vmem:[#allocation3 + $0x30] sm:$0xff] }
 0x145   :  { %468 = vst [vmem:[#allocation3 + $0x60] sm:$0xf0] %v464_v27  ;;  %409 = vst [vmem:[#allocation3 + $0x60] sm:$0xf] %v405_v29  ;;  %v806_v26 = vpack.c.bf16 %v553_v33, %v549_v25  ;;  %v814_v37 = vpack.c.bf16 %v555_v36, %v551_v35  ;;  %v857_v25 = vmov 0   ;;  %v760_v27 = vld [vmem:[%s1178_s3] sm:$0xff] }
 0x146   :  { %410 = vst [vmem:[#allocation3 + $0x68] sm:$0xf] %v406_v31  ;;  %837 = vset.pattern.permute.xlu0 %v857_v25  ;;  %838 = vset.pattern.permute.xlu1 %v857_v25  ;;  %v747_v35 = vld [vmem:[%s1179_s2] sm:$0xff] }
 0x147   :  { %v362_v39 = vpop.permute.xlu1 %361  ;;  %807 = vmatpush1.bf16.msra.mxu0 %v806_v26  ;;  %815 = vmatpush1.bf16.msra.mxu1 %v814_v37  ;;  %v304_v41 = vpop.permute.xlu0 %303 }
 0x148   :  { %v367_v34 = vsel %vm346_vm15, %v362_v39, %v1098_v40  ;;  %v307_v38 = vsel %vm287_vm2, %v1103_v45, %v304_v41  ;;  %v308_v28 = vsel %vm287_vm2, %v304_v41, %v1084_v30  ;;  %v557_v45 = vld [vmem:[#allocation3 + $0x40] sm:$0xff] }
 0x149   :  { %371 = vst [vmem:[#allocation3 + $0x50] sm:$0xf0] %v367_v34  ;;  %311 = vst [vmem:[#allocation3 + $0x50] sm:$0xf] %v307_v38  ;;  %v558_v46 = vld [vmem:[#allocation3 + $0x48] sm:$0xff] }
 0x14a   :  { %312 = vst [vmem:[#allocation3 + $0x58] sm:$0xf] %v308_v28 }
 0x14b   :  { %v479_v43 = vpop.permute.xlu1 %478  ;;  %v421_v44 = vpop.permute.xlu0 %420 }
 0x14c   :  { %v484_v47 = vsel %vm463_vm0, %v479_v43, %v1100_v42  ;;  %v424_v49 = vsel %vm390_vm11, %v1107_v48, %v421_v44  ;;  %v425_v40 = vsel %vm390_vm11, %v421_v44, %v1086_v32  ;;  %v561_v52 = vld [vmem:[#allocation3 + $0x60] sm:$0xff] }
 0x14d   :  { %v562_v50 = vld [vmem:[#allocation3 + $0x68] sm:$0xff]  ;;  %488 = vst [vmem:[#allocation3 + $0x70] sm:$0xf0] %v484_v47  ;;  %428 = vst [vmem:[#allocation3 + $0x70] sm:$0xf] %v424_v49  ;;  %v810_v54 = vpack.c.bf16 %v561_v52, %v557_v45 }
 0x14e   :  { %429 = vst [vmem:[#allocation3 + $0x78] sm:$0xf] %v425_v40  ;;  %v808_v30 = vpack.c.bf16 %v562_v50, %v558_v46 }
 0x14f   :  { %v539_v55 = vpop.permute.xlu1 %538  ;;  %v519_v56 = vpop.permute.xlu0 %518 }
 0x150   :  { %809 = vmatprep.subr.bf16.mxu0 %v808_v30  ;;  %v523_v42 = vsel %vm522_vm3, %v1111_v51, %v519_v56  ;;  %v524_v58 = vsel %vm522_vm3, %v519_v56, %v1090_v24  ;;  %v559_v0 = vld [vmem:[#allocation3 + $0x50] sm:$0xff] }
 0x151   :  { %811 = vmatpush1.bf16.msra.mxu0 %v810_v54  ;;  %527 = vst [vmem:[#allocation3 + $0x80] sm:$0xf] %v523_v42  ;;  %528 = vst [vmem:[#allocation3 + $0x88] sm:$0xf] %v524_v58  ;;  %v560_v59 = vld [vmem:[#allocation3 + $0x58] sm:$0xff] }
 0x153   :  { %v537_v32 = vpop.permute.xlu1 %536  ;;  %v541_v48 = vpop.permute.xlu0 %540 }
 0x154   :  { %v542_v60 = vsel %vm522_vm3, %v537_v32, %v539_v55  ;;  %v543_v62 = vsel %vm522_vm3, %v539_v55, %v541_v48  ;;  %v563_v1 = vld [vmem:[#allocation3 + $0x70] sm:$0xff] }
 0x155   :  { %v564_v63 = vld [vmem:[#allocation3 + $0x78] sm:$0xff]  ;;  %546 = vst [vmem:[#allocation3 + $0x90] sm:$0xf] %v542_v60  ;;  %547 = vst [vmem:[#allocation3 + $0x98] sm:$0xf] %v543_v62  ;;  %v818_v4 = vpack.c.bf16 %v563_v1, %v559_v0 }
 0x156   :  { %v816_v2 = vpack.c.bf16 %v564_v63, %v560_v59 }
 0x158   :  { %817 = vmatprep.subr.bf16.mxu1 %v816_v2  ;;  %v566_v51 = vld [vmem:[#allocation3 + $0x88] sm:$0xf]  ;;  %v565_v24 = vld [vmem:[#allocation3 + $0x80] sm:$0xf] }
 0x159   :  { %819 = vmatpush1.bf16.msra.mxu1 %v818_v4  ;;  %796 = vmatprep.subr.msk.mxu0 %vm572_vm4, %v566_v51 }
 0x15a   :  { %797 = vmatpush1.msk.msra.mxu0 %vm572_vm4, %v565_v24 }
 0x15b   :  { %798 = vmatmul.mubr.msk.f32.vlgmr.msra.gmra.mrb[0].mxu0 %vm330_vm9, %v548_v5 }
 0x15c   :  { %v568_v53 = vld [vmem:[#allocation3 + $0x98] sm:$0xf]  ;;  %v567_v6 = vld [vmem:[#allocation3 + $0x90] sm:$0xf] }
 0x15d   :  { %799 = vmatprep.subr.msk.mxu1 %vm572_vm4, %v568_v53 }
 0x15e   :  { %800 = vmatpush1.msk.msra.mxu1 %vm572_vm4, %v567_v6 }
 0x15f   :  { %801 = vmatmul.mubr.msk.f32.vlgmr.msra.gmra.mrb[0].mxu1 %vm330_vm9, %v548_v5 }
 0x22e   :  { %v651_v57 = vpop.f32.mrb[0].mxu0 }
 0x22f   :  { %v653_v7 = vpop.f32.mrb[1].mxu0 }
 0x230   :  { %v727_v8 = vadd.f32 %v653_v7, %v651_v57 }
 0x232   :  { %v722_v61 = vpop.f32.mrb[0].mxu1 }
 0x233   :  { %v728_v10 = vadd.f32 %v727_v8, %v722_v61  ;;  %v724_v12 = vpop.f32.mrb[1].mxu1 }
 0x235   :  { %v729_v13 = vadd.f32 %v728_v10, %v724_v12 }
 0x237   :  { %730 = vadd.xlane.f32.xlu0 %v729_v13 }
 0x2c4   :  { %v731_v14 = vpop.xlane.xlu0 %730 }
 0x2c5   :  { %v732_v3 = vmul.f32 0.001953125, %v731_v14 }
 0x2c7   :  { %v733_v9 = vsub.f32 %v651_v57, %v732_v3  ;;  %v734_v15 = vsub.f32 %v653_v7, %v732_v3  ;;  %v735_v16 = vsub.f32 %v722_v61, %v732_v3  ;;  %v736_v17 = vsub.f32 %v724_v12, %v732_v3 }
 0x2c9   :  { %v737_v18 = vmul.f32 %v733_v9, %v733_v9  ;;  %v738_v19 = vmul.f32 %v734_v15, %v734_v15  ;;  %v739_v20 = vmul.f32 %v735_v16, %v735_v16  ;;  %v740_v22 = vmul.f32 %v736_v17, %v736_v17 }
 0x2cb   :  { %v741_v21 = vadd.f32 %v738_v19, %v737_v18 }
 0x2cd   :  { %v742_v23 = vadd.f32 %v741_v21, %v739_v20 }
 0x2cf   :  { %v743_v11 = vadd.f32 %v742_v23, %v740_v22 }
 0x2d1   :  { %744 = vadd.xlane.f32.xlu1 %v743_v11 }
 0x2e2   :  { %763 = vperm.xlu1 %838, %v760_v27  }
 0x35e   :  { %v745_v29 = vpop.xlane.xlu1 %744 }
 0x35f   :  { %v746_v31 = vmul.f32 0.001953125, %v745_v29 }
 0x361   :  { %v748_v33 = vadd.f32 1e-05, %v746_v31 }
 0x362   :  { %v764_v39 = vpop.permute.xlu1 %763 }
 0x363   :  { %839 = vrsqrt.f32 %v748_v33 }
 0x36d   :  { %v840_v36 = vpop.eup %839 }
 0x36e   :  { %v750_v26 = vmul.f32 %v840_v36, %v747_v35 }
 0x370   :  { %753 = vperm.xlu0 %837, %v750_v26  }
 0x3ef   :  { %v754_v37 = vpop.permute.xlu0 %753 }
 0x3f0   :  { %v756_v41 = vmul.f32 %v754_v37, %v733_v9  ;;  %v757_v34 = vmul.f32 %v754_v37, %v734_v15  ;;  %v758_v38 = vmul.f32 %v754_v37, %v735_v16  ;;  %v759_v28 = vmul.f32 %v754_v37, %v736_v17 }
 0x3f2   :  { %v766_v43 = vadd.f32 %v764_v39, %v756_v41  ;;  %v767_v44 = vadd.f32 %v764_v39, %v757_v34  ;;  %v768_v46 = vadd.f32 %v764_v39, %v758_v38  ;;  %v769_v47 = vadd.f32 %v764_v39, %v759_v28 }
 0x3f4   :  { %v770_v49 = vmul.f32 0.01, %v766_v43  ;;  %v771_v40 = vmul.f32 0.01, %v767_v44  ;;  %v772_v50 = vmul.f32 0.01, %v768_v46 }
 0x3f5   :  { %v773_v45 = vmul.f32 0.01, %v769_v47 }
 0x3f6   :  { %v774_v52 = vmax.f32 %v766_v43, %v770_v49  ;;  %v775_v30 = vmax.f32 %v767_v44, %v771_v40  ;;  %v776_v54 = vmax.f32 %v768_v46, %v772_v50 }
 0x3f7   :  { %v777_v55 = vmax.f32 %v769_v47, %v773_v45 }
 0x3f8   :  { %778 = vst [vmem:[%s1180_s5] sm:$0xff] %v774_v52  ;;  %779 = vst [vmem:[%s1180_s5 + $0x8] sm:$0xff] %v775_v30 }
 0x3f9   :  { %802 = vst [vmem:[%s1180_s5 + $0x10] sm:$0xff] %v776_v54  ;;  %803 = vst [vmem:[%s1180_s5 + $0x18] sm:$0xff] %v777_v55 }

</bundles_post_ra>
